<compile_context>
chip_gen: v7x
topology: tpu7x:2x2x1
jax: 0.10.0
libtpu: 0.0.40
codegen_flags: <defaults>
</compile_context>

<pallas_src>
import functools

import jax
import jax.numpy as jnp
from jax import lax
from jax.experimental import pallas as pl
from jax.experimental.pallas import tpu as pltpu


_LANE = 128
_SUBLANE = 8


def _round_up(x, m):
    return (x + m - 1) // m * m


def _pad2d(a, rows, cols):
    return jnp.pad(a, ((0, rows - a.shape[0]), (0, cols - a.shape[1])))


# ---------------------------------------------------------------------------
# Fused Pallas kernel: main MLP + aux branch + masked softmax, one grid step
# per batch tile.  All layer dims / positions are static Python ints.
# ---------------------------------------------------------------------------
def _fused_sifer_kernel(*refs, n_main, n_aux, aux_position, num_bins):
    # refs = (x_ref, w_0 ... w_{L-1}, bias_ref, logits_ref, sh_ref)
    n_layers = n_main + n_aux
    x_ref = refs[0]
    w_refs = refs[1:1 + n_layers]
    bias_ref = refs[1 + n_layers]
    logits_ref, sh_ref = refs[2 + n_layers:]

    def linear(h, li, activate):
        w = w_refs[li][...]                          # bf16 (in_p, out_p)
        out_dim = w.shape[1]
        b = bias_ref[li:li + 1, :out_dim]            # f32  (1, out_p)
        y = jnp.dot(h.astype(jnp.bfloat16), w,
                    preferred_element_type=jnp.float32) + b
        if activate:
            y = jnp.maximum(y, 0.0)
        return y

    # ---- main trunk --------------------------------------------------------
    h = x_ref[...].astype(jnp.float32)
    aux_h = None
    for li in range(n_main):
        h = linear(h, li, activate=(li < n_main - 1))
        if li == aux_position:                       # static int comparison
            aux_h = h                                # out[aux_position] (post-ReLU)
    logits_ref[...] = h.astype(logits_ref.dtype)

    # ---- aux branch --------------------------------------------------------
    s = aux_h
    for ai in range(n_aux):
        s = linear(s, n_main + ai, activate=(ai < n_aux - 1))

    # ---- masked softmax over the valid num_bins lanes (all f32) ------------
    lane = lax.broadcasted_iota(jnp.int32, s.shape, dimension=1)
    s = jnp.where(lane < num_bins, s, jnp.float32(-1e30))
    m = jnp.max(s, axis=-1, keepdims=True)
    e = jnp.exp(s - m)
    denom = jnp.sum(e, axis=-1, keepdims=True)
    sh_ref[...] = (e / denom).astype(sh_ref.dtype)


# ---------------------------------------------------------------------------
# Parameter construction (unpadded, mirrors the PyTorch module)
# ---------------------------------------------------------------------------
def init_sifer_cross_params(key, hidden_layers, aux_layers, aux_position,
                            in_features, out_classes, num_bins):
    """Weights stored as (in_dim, out_dim); biases as (1, out_dim)."""
    def make_linear(k, in_dim, out_dim):
        kw, kb = jax.random.split(k)
        bound = 1.0 / jnp.sqrt(float(in_dim))        # nn.Linear default range
        w = jax.random.uniform(kw, (in_dim, out_dim), jnp.float32, -bound, bound)
        b = jax.random.uniform(kb, (1, out_dim), jnp.float32, -bound, bound)
        return {"w": w, "b": b}

    keys = jax.random.split(key, len(hidden_layers) + len(aux_layers) + 2)
    ki = 0

    main = []
    in_dim = in_features
    for h in hidden_layers:
        main.append(make_linear(keys[ki], in_dim, h)); ki += 1
        in_dim = h
    main.append(make_linear(keys[ki], in_dim, out_classes)); ki += 1

    aux = []
    in_dim = hidden_layers[aux_position]
    for h in aux_layers:
        aux.append(make_linear(keys[ki], in_dim, h)); ki += 1
        in_dim = h
    aux.append(make_linear(keys[ki], in_dim, num_bins)); ki += 1

    return {"main": main, "aux": aux, "aux_position": aux_position,
            "in_features": in_features, "out_classes": out_classes,
            "num_bins": num_bins}


def prepare_padded_params(params):
    """Pad + pack parameters for the fused kernel.

    Returns (arrays, config):
      arrays["weights"]: list of bf16 (in_p, out_p) weights, main then aux.
                         First layer in-dim is padded only to a multiple of 8;
                         every out-dim (and subsequent in-dim) to 128 lanes.
      arrays["biases"] : one f32 (n_layers, max_out_p) packed bias table.
      config           : plain-Python static ints (never traced by jit).
    """
    main, aux = params["main"], params["aux"]
    in_features = params["in_features"]
    n_main, n_aux = len(main), len(aux)

    in_p0 = _round_up(in_features, _SUBLANE)

    weights, bias_rows = [], []
    for idx, layer in enumerate(main + aux):
        w, b = layer["w"], layer["b"]
        ip = in_p0 if idx == 0 else _round_up(w.shape[0], _LANE)
        op = _round_up(w.shape[1], _LANE)
        weights.append(_pad2d(w, ip, op).astype(jnp.bfloat16))
        bias_rows.append(_pad2d(b, 1, op))            # keep biases f32

    max_op = max(w.shape[1] for w in weights)
    biases = jnp.concatenate([_pad2d(b, 1, max_op) for b in bias_rows], axis=0)

    arrays = {"weights": weights, "biases": biases}
    config = {
        "n_main": n_main, "n_aux": n_aux,
        "aux_position": int(params["aux_position"]),
        "in_features": int(in_features), "in_padded": int(in_p0),
        "out_classes": int(params["out_classes"]),
        "num_bins": int(params["num_bins"]),
    }
    return arrays, config


# ---------------------------------------------------------------------------
# Tile selection + VMEM budget
# ---------------------------------------------------------------------------
def _pick_batch_tile(batch):
    # Amortize the ~0.35us per-grid-step overhead with big tiles, but keep
    # >= 2 grid steps where possible so a "parallel" batch axis can shard
    # across both v7x TensorCores.
    for tb in (512, 256, 128):
        if batch >= 2 * tb:
            return tb
    if batch <= _SUBLANE:
        return _round_up(batch, _SUBLANE)
    return _round_up((batch + 1) // 2, _SUBLANE)


def _estimate_vmem_limit(tb, in_p, weights, biases, out_p, bins_p):
    wbytes = sum(int(w.size) * w.dtype.itemsize for w in weights)
    bbytes = int(biases.size) * biases.dtype.itemsize
    max_w = max(w.shape[1] for w in weights)
    est = (2 * tb * in_p * 4                    # double-buffered x tile
           + 2 * (wbytes + bbytes)              # resident params (2 buffers)
           + 2 * tb * (out_p + bins_p) * 4      # double-buffered output tiles
           + 8 * tb * max_w * 4)                # activation / working headroom
    # >= 32 MiB (v5e scoped default is only 16 MiB), capped well below 128 MiB
    # and compatible with v7x's 64 MiB physical VMEM for realistic configs.
    return int(min(max(2 * est, 32 * 1024 * 1024), 96 * 1024 * 1024))


# ---------------------------------------------------------------------------
# Forward wrapper: one pallas_call for the whole network
# ---------------------------------------------------------------------------
def sifer_cross_forward(arrays, x, *, config):
    """Returns (main_logits, aux_softmax) exactly as SiFer_Cross.forward."""
    weights = arrays["weights"]
    biases = arrays["biases"]

    n_main = config["n_main"]
    n_aux = config["n_aux"]
    aux_position = config["aux_position"]
    in_features = config["in_features"]
    in_p = config["in_padded"]
    out_classes = config["out_classes"]
    num_bins = config["num_bins"]

    batch = x.shape[0]
    out_p = weights[n_main - 1].shape[1]
    bins_p = weights[-1].shape[1]

    tb = _pick_batch_tile(batch)
    batch_p = _round_up(batch, tb)
    grid = (batch_p // tb,)

    # batch-tail padding + (tiny) feature padding to a sublane multiple
    x_p = jnp.pad(x.astype(jnp.float32),
                  ((0, batch_p - batch), (0, in_p - in_features)))

    in_specs = [pl.BlockSpec((tb, in_p), lambda i: (i, 0))]
    # Weights / packed biases: constant index_map -> DMA'd once, resident in
    # VMEM across all batch tiles.
    for w in weights:
        in_specs.append(pl.BlockSpec(w.shape, lambda i: (0, 0)))
    in_specs.append(pl.BlockSpec(biases.shape, lambda i: (0, 0)))

    out_shape = (jax.ShapeDtypeStruct((batch_p, out_p), jnp.float32),
                 jax.ShapeDtypeStruct((batch_p, bins_p), jnp.float32))
    out_specs = (pl.BlockSpec((tb, out_p), lambda i: (i, 0)),
                 pl.BlockSpec((tb, bins_p), lambda i: (i, 0)))

    vmem_limit = _estimate_vmem_limit(tb, in_p, weights, biases, out_p, bins_p)

    kernel = functools.partial(
        _fused_sifer_kernel,
        n_main=n_main, n_aux=n_aux,
        aux_position=aux_position, num_bins=num_bins)

    logits_p, sh_p = pl.pallas_call(
        kernel,
        grid=grid,
        in_specs=in_specs,
        out_specs=out_specs,
        out_shape=out_shape,
        compiler_params=pltpu.CompilerParams(
            dimension_semantics=("parallel",),
            vmem_limit_bytes=vmem_limit),
    )(x_p, *weights, biases)

    return logits_p[:batch, :out_classes], sh_p[:batch, :num_bins]


# ---------------------------------------------------------------------------
# Pure-JAX f32 reference (unpadded params) for a correctness check
# ---------------------------------------------------------------------------
def sifer_cross_ref(params, x):
    main, aux, aux_position = params["main"], params["aux"], params["aux_position"]
    out = []
    h = x
    for layer in main[:-1]:
        h = jax.nn.relu(h @ layer["w"] + layer["b"])
        out.append(h)
    logits = h @ main[-1]["w"] + main[-1]["b"]
    out.append(logits)
    sh = out[aux_position]
    for layer in aux[:-1]:
        sh = jax.nn.relu(sh @ layer["w"] + layer["b"])
    sh = jax.nn.softmax(sh @ aux[-1]["w"] + aux[-1]["b"], axis=-1)
    return logits, sh


if __name__ == "__main__":
    # Small configuration consistent with the module's constructor.
    batch = 64
    in_features = 16
    hidden_layers = [32, 32]
    aux_layers = [32, 16]
    aux_position = 1
    out_classes = 8
    num_bins = 8

    root = jax.random.PRNGKey(0)
    k_param, k_x = jax.random.split(root)
    params = init_sifer_cross_params(
        k_param, hidden_layers, aux_layers, aux_position,
        in_features, out_classes, num_bins)
    arrays, config = prepare_padded_params(params)
    x = jax.random.normal(k_x, (batch, in_features), jnp.float32)

    fwd = jax.jit(functools.partial(sifer_cross_forward, config=config))
    logits, sh = fwd(arrays, x)
    logits = jax.block_until_ready(logits)
    sh = jax.block_until_ready(sh)

    # Sanity check against the pure-JAX f32 reference (bf16 matmul operands
    # in the kernel -> relaxed tolerance; softmax math stays f32/exact).
    ref_logits, ref_sh = sifer_cross_ref(params, x)
    assert logits.shape == (batch, out_classes)
    assert sh.shape == (batch, num_bins)
    assert jnp.allclose(logits, ref_logits, rtol=2e-2, atol=2e-2)
    assert jnp.allclose(sh, ref_sh, rtol=2e-2, atol=2e-2)
    assert jnp.allclose(jnp.sum(sh, axis=-1), 1.0, atol=1e-4)

    print("KERNEL_OK")
</pallas_src>

<mosaic_0001>
module attributes {stable_mosaic.version = 11 : i64} {
  func.func @_fused_sifer_kernel(%arg0: i32, %arg1: memref<32x16xf32, #tpu.memory_space<vmem>>, %arg2: memref<16x128xbf16, #tpu.memory_space<vmem>>, %arg3: memref<128x128xbf16, #tpu.memory_space<vmem>>, %arg4: memref<128x128xbf16, #tpu.memory_space<vmem>>, %arg5: memref<128x128xbf16, #tpu.memory_space<vmem>>, %arg6: memref<128x128xbf16, #tpu.memory_space<vmem>>, %arg7: memref<128x128xbf16, #tpu.memory_space<vmem>>, %arg8: memref<6x128xf32, #tpu.memory_space<vmem>>, %arg9: memref<32x128xf32, #tpu.memory_space<vmem>>, %arg10: memref<32x128xf32, #tpu.memory_space<vmem>>) attributes {dimension_semantics = [#tpu.dimension_semantics<parallel>], iteration_bounds = array<i64: 2>, scalar_prefetch = 0 : i64, scratch_operands = 0 : i64, tpu.core_type = #tpu.core_type<tc>, window_params = [{transform_indices = @transform_0, window_bounds = array<i64: 32, 16>}, {pipeline_mode = #tpu.pipeline_mode<synchronous>, transform_indices = @transform_1, window_bounds = array<i64: 16, 128>}, {pipeline_mode = #tpu.pipeline_mode<synchronous>, transform_indices = @transform_2, window_bounds = array<i64: 128, 128>}, {pipeline_mode = #tpu.pipeline_mode<synchronous>, transform_indices = @transform_3, window_bounds = array<i64: 128, 128>}, {pipeline_mode = #tpu.pipeline_mode<synchronous>, transform_indices = @transform_4, window_bounds = array<i64: 128, 128>}, {pipeline_mode = #tpu.pipeline_mode<synchronous>, transform_indices = @transform_5, window_bounds = array<i64: 128, 128>}, {pipeline_mode = #tpu.pipeline_mode<synchronous>, transform_indices = @transform_6, window_bounds = array<i64: 128, 128>}, {pipeline_mode = #tpu.pipeline_mode<synchronous>, transform_indices = @transform_7, window_bounds = array<i64: 6, 128>}, {transform_indices = @transform_8, window_bounds = array<i64: 32, 128>}, {transform_indices = @transform_9, window_bounds = array<i64: 32, 128>}]} {
    %c0 = arith.constant 0 : index
    %c0_0 = arith.constant 0 : index
    %0 = vector.load %arg1[%c0, %c0_0] : memref<32x16xf32, #tpu.memory_space<vmem>>, vector<32x16xf32>
    %c0_1 = arith.constant 0 : index
    %c0_2 = arith.constant 0 : index
    %1 = vector.load %arg2[%c0_1, %c0_2] : memref<16x128xbf16, #tpu.memory_space<vmem>>, vector<16x128xbf16>
    %c0_3 = arith.constant 0 : index
    %c0_4 = arith.constant 0 : index
    %2 = vector.load %arg8[%c0_3, %c0_4] : memref<6x128xf32, #tpu.memory_space<vmem>>, vector<1x128xf32>
    %3 = arith.truncf %0 : vector<32x16xf32> to vector<32x16xbf16>
    %cst = arith.constant dense<0.000000e+00> : vector<32x128xf32>
    %4 = tpu.matmul %3, %1, %cst {dimension_numbers = #tpu.dot_dimension_numbers<[1], [0], [0], [1], [0, 0, 1, 1], [], []>} : vector<32x16xbf16>, vector<16x128xbf16>, vector<32x128xf32> -> vector<32x128xf32>
    %5 = vector.broadcast %2 : vector<1x128xf32> to vector<32x128xf32>
    %6 = arith.addf %4, %5 : vector<32x128xf32>
    %cst_5 = arith.constant 0.000000e+00 : f32
    %7 = vector.broadcast %cst_5 : f32 to vector<32x128xf32>
    %8 = arith.maximumf %6, %7 : vector<32x128xf32>
    %c0_6 = arith.constant 0 : index
    %c0_7 = arith.constant 0 : index
    %9 = vector.load %arg3[%c0_6, %c0_7] : memref<128x128xbf16, #tpu.memory_space<vmem>>, vector<128x128xbf16>
    %c1 = arith.constant 1 : index
    %c0_8 = arith.constant 0 : index
    %10 = vector.load %arg8[%c1, %c0_8] : memref<6x128xf32, #tpu.memory_space<vmem>>, vector<1x128xf32>
    %11 = arith.truncf %8 : vector<32x128xf32> to vector<32x128xbf16>
    %cst_9 = arith.constant dense<0.000000e+00> : vector<32x128xf32>
    %12 = tpu.matmul %11, %9, %cst_9 {dimension_numbers = #tpu.dot_dimension_numbers<[1], [0], [0], [1], [0, 0, 1, 1], [], []>} : vector<32x128xbf16>, vector<128x128xbf16>, vector<32x128xf32> -> vector<32x128xf32>
    %13 = vector.broadcast %10 : vector<1x128xf32> to vector<32x128xf32>
    %14 = arith.addf %12, %13 : vector<32x128xf32>
    %cst_10 = arith.constant 0.000000e+00 : f32
    %15 = vector.broadcast %cst_10 : f32 to vector<32x128xf32>
    %16 = arith.maximumf %14, %15 : vector<32x128xf32>
    %c0_11 = arith.constant 0 : index
    %c0_12 = arith.constant 0 : index
    %17 = vector.load %arg4[%c0_11, %c0_12] : memref<128x128xbf16, #tpu.memory_space<vmem>>, vector<128x128xbf16>
    %c2 = arith.constant 2 : index
    %c0_13 = arith.constant 0 : index
    %18 = vector.load %arg8[%c2, %c0_13] : memref<6x128xf32, #tpu.memory_space<vmem>>, vector<1x128xf32>
    %19 = arith.truncf %16 : vector<32x128xf32> to vector<32x128xbf16>
    %cst_14 = arith.constant dense<0.000000e+00> : vector<32x128xf32>
    %20 = tpu.matmul %19, %17, %cst_14 {dimension_numbers = #tpu.dot_dimension_numbers<[1], [0], [0], [1], [0, 0, 1, 1], [], []>} : vector<32x128xbf16>, vector<128x128xbf16>, vector<32x128xf32> -> vector<32x128xf32>
    %21 = vector.broadcast %18 : vector<1x128xf32> to vector<32x128xf32>
    %22 = arith.addf %20, %21 : vector<32x128xf32>
    %c0_15 = arith.constant 0 : index
    %c0_16 = arith.constant 0 : index
    %23 = vector.load %arg9[%c0_15, %c0_16] : memref<32x128xf32, #tpu.memory_space<vmem>>, vector<32x128xf32>
    tpu.vector_store %arg9[%c0_15, %c0_16], %22 {strides = array<i32>} : memref<32x128xf32, #tpu.memory_space<vmem>>, vector<32x128xf32>,
    %c0_17 = arith.constant 0 : index
    %c0_18 = arith.constant 0 : index
    %24 = vector.load %arg5[%c0_17, %c0_18] : memref<128x128xbf16, #tpu.memory_space<vmem>>, vector<128x128xbf16>
    %c3 = arith.constant 3 : index
    %c0_19 = arith.constant 0 : index
    %25 = vector.load %arg8[%c3, %c0_19] : memref<6x128xf32, #tpu.memory_space<vmem>>, vector<1x128xf32>
    %26 = arith.truncf %16 : vector<32x128xf32> to vector<32x128xbf16>
    %cst_20 = arith.constant dense<0.000000e+00> : vector<32x128xf32>
    %27 = tpu.matmul %26, %24, %cst_20 {dimension_numbers = #tpu.dot_dimension_numbers<[1], [0], [0], [1], [0, 0, 1, 1], [], []>} : vector<32x128xbf16>, vector<128x128xbf16>, vector<32x128xf32> -> vector<32x128xf32>
    %28 = vector.broadcast %25 : vector<1x128xf32> to vector<32x128xf32>
    %29 = arith.addf %27, %28 : vector<32x128xf32>
    %cst_21 = arith.constant 0.000000e+00 : f32
    %30 = vector.broadcast %cst_21 : f32 to vector<32x128xf32>
    %31 = arith.maximumf %29, %30 : vector<32x128xf32>
    %c0_22 = arith.constant 0 : index
    %c0_23 = arith.constant 0 : index
    %32 = vector.load %arg6[%c0_22, %c0_23] : memref<128x128xbf16, #tpu.memory_space<vmem>>, vector<128x128xbf16>
    %c4 = arith.constant 4 : index
    %c0_24 = arith.constant 0 : index
    %33 = vector.load %arg8[%c4, %c0_24] : memref<6x128xf32, #tpu.memory_space<vmem>>, vector<1x128xf32>
    %34 = arith.truncf %31 : vector<32x128xf32> to vector<32x128xbf16>
    %cst_25 = arith.constant dense<0.000000e+00> : vector<32x128xf32>
    %35 = tpu.matmul %34, %32, %cst_25 {dimension_numbers = #tpu.dot_dimension_numbers<[1], [0], [0], [1], [0, 0, 1, 1], [], []>} : vector<32x128xbf16>, vector<128x128xbf16>, vector<32x128xf32> -> vector<32x128xf32>
    %36 = vector.broadcast %33 : vector<1x128xf32> to vector<32x128xf32>
    %37 = arith.addf %35, %36 : vector<32x128xf32>
    %cst_26 = arith.constant 0.000000e+00 : f32
    %38 = vector.broadcast %cst_26 : f32 to vector<32x128xf32>
    %39 = arith.maximumf %37, %38 : vector<32x128xf32>
    %c0_27 = arith.constant 0 : index
    %c0_28 = arith.constant 0 : index
    %40 = vector.load %arg7[%c0_27, %c0_28] : memref<128x128xbf16, #tpu.memory_space<vmem>>, vector<128x128xbf16>
    %c5 = arith.constant 5 : index
    %c0_29 = arith.constant 0 : index
    %41 = vector.load %arg8[%c5, %c0_29] : memref<6x128xf32, #tpu.memory_space<vmem>>, vector<1x128xf32>
    %42 = arith.truncf %39 : vector<32x128xf32> to vector<32x128xbf16>
    %cst_30 = arith.constant dense<0.000000e+00> : vector<32x128xf32>
    %43 = tpu.matmul %42, %40, %cst_30 {dimension_numbers = #tpu.dot_dimension_numbers<[1], [0], [0], [1], [0, 0, 1, 1], [], []>} : vector<32x128xbf16>, vector<128x128xbf16>, vector<32x128xf32> -> vector<32x128xf32>
    %44 = vector.broadcast %41 : vector<1x128xf32> to vector<32x128xf32>
    %45 = arith.addf %43, %44 : vector<32x128xf32>
    %46 = tpu.iota {dimensions = array<i32: 1>} : vector<32x128xi32>
    %c8_i32 = arith.constant 8 : i32
    %47 = vector.broadcast %c8_i32 : i32 to vector<32x128xi32>
    %48 = arith.cmpi slt, %46, %47 : vector<32x128xi32>
    %cst_31 = arith.constant -1.000000e+30 : f32
    %49 = vector.broadcast %cst_31 : f32 to vector<32x128xf32>
    %50 = arith.select %48, %45, %49 : vector<32x128xi1>, vector<32x128xf32>
    %cst_32 = arith.constant dense<0xFF800000> : vector<32xf32>
    %51 = vector.multi_reduction <maximumf>, %50, %cst_32 [1] : vector<32x128xf32> to vector<32xf32>
    %52 = vector.shape_cast %51 : vector<32xf32> to vector<32x1xf32>
    %53 = vector.broadcast %52 : vector<32x1xf32> to vector<32x128xf32>
    %54 = arith.subf %50, %53 : vector<32x128xf32>
    %55 = math.exp %54 : vector<32x128xf32>
    %cst_33 = arith.constant dense<0.000000e+00> : vector<32xf32>
    %56 = vector.multi_reduction <add>, %55, %cst_33 [1] : vector<32x128xf32> to vector<32xf32>
    %57 = vector.shape_cast %56 : vector<32xf32> to vector<32x1xf32>
    %58 = vector.broadcast %57 : vector<32x1xf32> to vector<32x128xf32>
    %59 = arith.divf %55, %58 : vector<32x128xf32>
    %c0_34 = arith.constant 0 : index
    %c0_35 = arith.constant 0 : index
    %60 = vector.load %arg10[%c0_34, %c0_35] : memref<32x128xf32, #tpu.memory_space<vmem>>, vector<32x128xf32>
    tpu.vector_store %arg10[%c0_34, %c0_35], %59 {strides = array<i32>} : memref<32x128xf32, #tpu.memory_space<vmem>>, vector<32x128xf32>,
    return
  }
  func.func @transform_0(%arg0: i32) -> (i32, i32) {
    %c0_i32 = arith.constant 0 : i32
    %c0_i32_0 = arith.constant 0 : i32
    return %arg0, %c0_i32 : i32, i32
  }
  func.func @transform_1(%arg0: i32) -> (i32, i32) {
    %c0_i32 = arith.constant 0 : i32
    %c0_i32_0 = arith.constant 0 : i32
    %c0_i32_1 = arith.constant 0 : i32
    return %c0_i32, %c0_i32_0 : i32, i32
  }
  func.func @transform_2(%arg0: i32) -> (i32, i32) {
    %c0_i32 = arith.constant 0 : i32
    %c0_i32_0 = arith.constant 0 : i32
    %c0_i32_1 = arith.constant 0 : i32
    return %c0_i32, %c0_i32_0 : i32, i32
  }
  func.func @transform_3(%arg0: i32) -> (i32, i32) {
    %c0_i32 = arith.constant 0 : i32
    %c0_i32_0 = arith.constant 0 : i32
    %c0_i32_1 = arith.constant 0 : i32
    return %c0_i32, %c0_i32_0 : i32, i32
  }
  func.func @transform_4(%arg0: i32) -> (i32, i32) {
    %c0_i32 = arith.constant 0 : i32
    %c0_i32_0 = arith.constant 0 : i32
    %c0_i32_1 = arith.constant 0 : i32
    return %c0_i32, %c0_i32_0 : i32, i32
  }
  func.func @transform_5(%arg0: i32) -> (i32, i32) {
    %c0_i32 = arith.constant 0 : i32
    %c0_i32_0 = arith.constant 0 : i32
    %c0_i32_1 = arith.constant 0 : i32
    return %c0_i32, %c0_i32_0 : i32, i32
  }
  func.func @transform_6(%arg0: i32) -> (i32, i32) {
    %c0_i32 = arith.constant 0 : i32
    %c0_i32_0 = arith.constant 0 : i32
    %c0_i32_1 = arith.constant 0 : i32
    return %c0_i32, %c0_i32_0 : i32, i32
  }
  func.func @transform_7(%arg0: i32) -> (i32, i32) {
    %c0_i32 = arith.constant 0 : i32
    %c0_i32_0 = arith.constant 0 : i32
    %c0_i32_1 = arith.constant 0 : i32
    return %c0_i32, %c0_i32_0 : i32, i32
  }
  func.func @transform_8(%arg0: i32) -> (i32, i32) {
    %c0_i32 = arith.constant 0 : i32
    %c0_i32_0 = arith.constant 0 : i32
    return %arg0, %c0_i32 : i32, i32
  }
  func.func @transform_9(%arg0: i32) -> (i32, i32) {
    %c0_i32 = arith.constant 0 : i32
    %c0_i32_0 = arith.constant 0 : i32
    return %arg0, %c0_i32 : i32, i32
  }
}

</mosaic_0001>

<bundles_post_ra>
// kernel: sifer_cross_forward.1
= control target key start
LH: loop header
LB: loop body
LE: loop exit
PB: predicated region body
PF: predicated region fallthrough
CT: control target
= control target key end

     0   :  { %15 = vsyncpa [#allocation3], 0  ;;  %s2024_s0 = inlined_call_operand.vmem [shape: f32[64,16], index: 0, kind: input, shape index: {}]   ;;  %s2025_s1 = inlined_call_operand.vmem [shape: bf16[16,128], index: 1, kind: input, shape index: {}]   ;;  %s2026_s2 = inlined_call_operand.vmem [shape: bf16[128,128], index: 2, kind: input, shape index: {}]   ;;  %s2027_s3 = inlined_call_operand.hbm [shape: bf16[128,128], index: 3, kind: input, shape index: {}]   ;;  %s2028_s4 = inlined_call_operand.hbm [shape: bf16[128,128], index: 4, kind: input, shape index: {}]   ;;  %s2029_s5 = inlined_call_operand.hbm [shape: bf16[128,128], index: 5, kind: input, shape index: {}]   ;;  %s2030_s6 = inlined_call_operand.hbm [shape: bf16[128,128], index: 6, kind: input, shape index: {}]   ;;  %s2031_s7 = inlined_call_operand.vmem [shape: f32[6,128], index: 7, kind: input, shape index: {}]   ;;  %s2032_s8 = inlined_call_operand.vmem [shape: f32[64,128], index: 8, kind: output, shape index: {0}]   ;;  %s2033_s9 = inlined_call_operand.vmem [shape: f32[64,128], index: 9, kind: output, shape index: {1}]  }
   0x1   :  { %16 = vsyncpa [#allocation5], 0 }
   0x2   :  { %17 = vsyncpa [#allocation8], 0  ;;  %s1806_s30 = smov 0  }
   0x3 LB: > { %s1281_s10 = sadd.s32 4294967295, %s1748_s30   ;;  %p1283_p0 = scmp.ge.s32.totalorder %s1748_s30, 1  ;;  %s1748_s30 = sphi %s1806_s30, %s23_s30  }
   0x4   : > { %p253_p1 = scmp.lt.s32.totalorder %s1748_s30, 3  ;;  %p1816_p2 = scmp.eq.s32.totalorder %s1281_s10, 0 }
   0x5   : > { %s1750_s13 = smov [#allocation4]   ;;  %s1751_s15 = smov [#allocation2]  }
   0x6   : > { %s2037_s11 = scalar_select %p1816_p2, 1, 0 }
   0x7   : > { %p1820_p3 = pnand %p1283_p0, %p253_p1  ;;  %s284_s14 = sshll.u32 %s1750_s13, 4  ;;  %s1824_s14 = int_to_ptr.vmem [resolvable:$true] %s284_s14 }
   0x8   : > { %s271_s16 = sshll.u32 %s1751_s15, 4  ;;  %s1752_s18 = smov [#allocation6]   ;;  %s1828_s16 = int_to_ptr.vmem [resolvable:$true] %s271_s16 }
   0x9   : > { %s2038_s12 = scalar_select %p1820_p3, 1, 0 }
   0xa   : > { %p1526_p4 = pneg %p1820_p3  ;;  %s297_s19 = sshll.u32 %s1752_s18, 4  ;;  %s1836_s19 = int_to_ptr.vmem [resolvable:$true] %s297_s19 }
   0xb   : > { %s1753_s20 = smov [#allocation7]   ;;  %s1618_s24 = scalar_lea.hbm %s2028_s4, 1024 }
   0xc   : > { %p1832_p5 = pnand %p1816_p2, %p1526_p4  ;;  %s1838_s21 = sshll.u32 %s1753_s20, 4  ;;  %s311_s21 = int_to_ptr.vmem [resolvable:$true] %s1838_s21 }
   0xd   : > { %p1619_p6 = scmp.ne.s32.totalorder %s2028_s4, %s1618_s24  ;;  %p1625_p10 = scmp.lt.u32.totalorder %s1618_s24, %s2028_s4 }
   0xe   : > { %p1848_p7 = pneg %p1832_p5 }
  0x10   : > { %p1621_p8 = pnand %p1848_p7, %p1619_p6 }
  0x12   : > { %p1622_p9 = pneg %p1621_p8 }
  0x14   : > { %p1627_p11 = pnand %p1625_p10, %p1622_p9 }
  0x16   : > { %1630 = shalt.err (!%p1627_p11)
}
  0x17   : > { %s1631_s13 = scalar_lea.vmem %s1824_s14, 1024  ;;  %p1639_p1 = scmp.lt.s32.totalorder %s1824_s14, %s1824_s14 }
  0x18   : > { %p1632_p12 = scmp.ne.s32.totalorder %s1824_s14, %s1631_s13  ;;  %p1640_p4 = scmp.lt.s32.totalorder %s1631_s13, %s1631_s13 }
  0x1a   : > { %p1634_p13 = pnand %p1632_p12, %p1848_p7  ;;  %p1641_p6 = por %p1640_p4, %p1639_p1 }
  0x1c   : > { %p1635_p0 = pneg %p1634_p13 }
  0x1e   : > { %p1642_p8 = pnand %p1641_p6, %p1635_p0 }
  0x20   : > { %1645 = shalt.err (!%p1642_p8)
}
  0x21   : > { %s1754_s15 = smov 64   ;;  %s1755_s18 = smov 4  }
  0x22   : > { %1532 = dma.hbm_to_vmem [thread:$0]  (!%p1832_p5), %s2028_s4, 1024, %s1824_s14, [#allocation5], %s1754_s15, %s1754_s15, %s1755_s18  }
  0x23   : > { %s1646_s25 = scalar_lea.hbm %s2027_s3, 1024 }
  0x24   : > { %p1647_p9 = scmp.ne.s32.totalorder %s2027_s3, %s1646_s25  ;;  %p1653_p12 = scmp.lt.u32.totalorder %s1646_s25, %s2027_s3 }
  0x26   : > { %p1649_p10 = pnand %p1647_p9, %p1848_p7 }
  0x28   : > { %p1650_p11 = pneg %p1649_p10 }
  0x2a   : > { %p1655_p13 = pnand %p1653_p12, %p1650_p11 }
  0x2c   : > { %1658 = shalt.err (!%p1655_p13)
}
  0x2d   : > { %s1659_s14 = scalar_lea.vmem %s1828_s16, 1024  ;;  %p1667_p6 = scmp.lt.s32.totalorder %s1828_s16, %s1828_s16 }
  0x2e   : > { %p1660_p0 = scmp.ne.s32.totalorder %s1828_s16, %s1659_s14  ;;  %p1668_p8 = scmp.lt.s32.totalorder %s1659_s14, %s1659_s14 }
  0x30   : > { %p1662_p1 = pnand %p1660_p0, %p1848_p7  ;;  %p1669_p9 = por %p1668_p8, %p1667_p6 }
  0x32   : > { %p1663_p4 = pneg %p1662_p1 }
  0x34   : > { %p1670_p10 = pnand %p1669_p9, %p1663_p4 }
  0x36   : > { %1673 = shalt.err (!%p1670_p10)
}
  0x37   : > { %1529 = dma.hbm_to_vmem [thread:$0]  (!%p1832_p5), %s2027_s3, 1024, %s1828_s16, [#allocation3], %s1754_s15, %s1754_s15, %s1755_s18  }
  0x38   : > { %s1674_s25 = scalar_lea.hbm %s2029_s5, 1024 }
  0x39   : > { %p1675_p11 = scmp.ne.s32.totalorder %s2029_s5, %s1674_s25  ;;  %p1681_p0 = scmp.lt.u32.totalorder %s1674_s25, %s2029_s5 }
  0x3b   : > { %p1677_p12 = pnand %p1675_p11, %p1848_p7 }
  0x3d   : > { %p1678_p13 = pneg %p1677_p12 }
  0x3f   : > { %p1683_p1 = pnand %p1681_p0, %p1678_p13 }
  0x41   : > { %1686 = shalt.err (!%p1683_p1)
}
  0x42   : > { %s1687_s16 = scalar_lea.vmem %s1836_s19, 1024  ;;  %p1695_p9 = scmp.lt.s32.totalorder %s1836_s19, %s1836_s19 }
  0x43   : > { %p1688_p4 = scmp.ne.s32.totalorder %s1836_s19, %s1687_s16  ;;  %p1696_p10 = scmp.lt.s32.totalorder %s1687_s16, %s1687_s16 }
  0x45   : > { %p1690_p6 = pnand %p1688_p4, %p1848_p7  ;;  %p1697_p11 = por %p1696_p10, %p1695_p9 }
  0x47   : > { %p1691_p8 = pneg %p1690_p6 }
  0x49   : > { %p1698_p12 = pnand %p1697_p11, %p1691_p8 }
  0x4b   : > { %1701 = shalt.err (!%p1698_p12)
}
  0x4c   : > { %1535 = dma.hbm_to_vmem [thread:$0]  (!%p1832_p5), %s2029_s5, 1024, %s1836_s19, [#allocation5], %s1754_s15, %s1754_s15, %s1755_s18  }
  0x4d   : > { %s1702_s24 = scalar_lea.hbm %s2030_s6, 1024 }
  0x4e   : > { %p1703_p13 = scmp.ne.s32.totalorder %s2030_s6, %s1702_s24  ;;  %p1709_p4 = scmp.lt.u32.totalorder %s1702_s24, %s2030_s6 }
  0x50   : > { %p1705_p0 = pnand %p1703_p13, %p1848_p7 }
  0x52   : > { %p1706_p1 = pneg %p1705_p0 }
  0x54   : > { %p1711_p6 = pnand %p1709_p4, %p1706_p1 }
  0x56   : > { %1714 = shalt.err (!%p1711_p6)
}
  0x57   : > { %s1715_s13 = scalar_lea.vmem %s311_s21, 1024  ;;  %p1723_p11 = scmp.lt.s32.totalorder %s311_s21, %s311_s21 }
  0x58   : > { %p1716_p8 = scmp.ne.s32.totalorder %s311_s21, %s1715_s13  ;;  %p1724_p12 = scmp.lt.s32.totalorder %s1715_s13, %s1715_s13 }
  0x5a   : > { %p1718_p9 = pnand %p1716_p8, %p1848_p7  ;;  %p1725_p2 = por %p1724_p12, %p1723_p11 }
  0x5c   : > { %p1719_p10 = pneg %p1718_p9 }
  0x5e   : > { %p1726_p3 = pnand %p1725_p2, %p1719_p10 }
  0x60   : > { %1729 = shalt.err (!%p1726_p3)
}
  0x61   : > { %1538 = dma.hbm_to_vmem [thread:$0]  (!%p1832_p5), %s2030_s6, 1024, %s311_s21, [#allocation8], %s1754_s15, %s1754_s15, %s1755_s18  }
  0x62   : > { %p2041_p13 = scmp.ne.s32.totalorder %s2038_s12, 0 }
  0x63   : > { %p2042_p7 = scmp.ne.s32.totalorder (!%p2041_p13), %s2037_s11, 0 }
  0x64   : > { %338 = sbr.rel (%p2041_p13) target bundleno = 1547 (0x60b), region = 52 }
  0x6b   : > { %1735 = dma.done.wait (%p2042_p7), [#allocation3], 1024  }
  0x6c   : > { %1737 = vsyncadd (%p2042_p7), [#allocation3], 4294966272 }
  0x6d   : > { %1739 = dma.done.wait (%p2042_p7), [#allocation5], 2048  }
  0x6e   : > { %1741 = vsyncadd (%p2042_p7), [#allocation5], 4294965248 }
  0x6f   : > { %1743 = dma.done.wait (%p2042_p7), [#allocation8], 1024  }
  0x70   : > { %1745 = vsyncadd (%p2042_p7), [#allocation8], 4294966272  ;;  %s1294_s12 = sshll.u32 %s1281_s10, 2  ;;  %v1561_v0 = vld [vmem:[%s2025_s1] sm:$0xff]   ;;  %vm429_vm0 = vcmask 130048   ;;  %v1563_v8 = vld [vmem:[%s2026_s2 + $0x8] sm:$0xff]  }
  0x71   : > { %p392_p2 = scmp.lt.s32.totalorder %s1294_s12, 7  ;;  %1404 = vmatprep.subr.bf16.mxu0 %v1561_v0  ;;  %v1562_v7 = vld [vmem:[%s2026_s2] sm:$0xff]   ;;  %v1564_v9 = vld [vmem:[%s2026_s2 + $0x10] sm:$0xff]   ;;  %v1565_v10 = vld [vmem:[%s2026_s2 + $0x18] sm:$0xff]  }
  0x72   : > { %1405 = vmatpush3.bf16.msra.mxu0 %v1561_v0  ;;  %1410 = vmatprep.subr.bf16.mxu1 %v1562_v7  ;;  %v1566_v11 = vld [vmem:[%s2026_s2 + $0x20] sm:$0xff]   ;;  %v1567_v12 = vld [vmem:[%s2026_s2 + $0x28] sm:$0xff]   ;;  %v1568_v13 = vld [vmem:[%s2026_s2 + $0x30] sm:$0xff]  }
  0x73   : > { %s2044_s12 = smov (!%p392_p2, %s1294_s12), 7  ;;  %1411 = vmatpush3.bf16.msra.mxu1 %v1562_v7  ;;  %v1569_v14 = vld [vmem:[%s2026_s2 + $0x38] sm:$0xff]   ;;  %v1570_v15 = vld [vmem:[#allocation2] sm:$0xff]   ;;  %v1572_v17 = vld [vmem:[#allocation2 + $0x8] sm:$0xff]  }
  0x74   : > { %s1962_s17 = sshll.u32 %s2044_s12, 3  ;;  %1412 = vmatprep.subr.bf16.mxu1 %v1563_v8  ;;  %v1571_v16 = vld [vmem:[#allocation4] sm:$0xff]   ;;  %1430 = vmatprep.subr.bf16.mxu0 %v1570_v15  ;;  %v1574_v18 = vld [vmem:[#allocation2 + $0x10] sm:$0xff]   ;;  %v1576_v19 = vld [vmem:[#allocation2 + $0x18] sm:$0xff]  }
  0x75   : > { %s395_s15 = scalar_lea.vmem %s2024_s0, %s1962_s17  ;;  %v1578_v20 = vld [vmem:[#allocation2 + $0x20] sm:$0xff]   ;;  %v1580_v21 = vld [vmem:[#allocation2 + $0x28] sm:$0xff]   ;;  %v1575_v38 = vld [vmem:[#allocation4 + $0x10] sm:$0xff]   ;;  %s401_s26 = scalar_lea.vmem %s2032_s8, %s1962_s17 }
  0x76   : > { %v410_v1 = vld [vmem:[%s395_s15] sm:$0xff]  ;;  %v411_v2 = vld [vmem:[%s395_s15 + $0x8] sm:$0xff]  ;;  %v412_v3 = vld [vmem:[%s395_s15 + $0x10] sm:$0xff]  ;;  %s407_s21 = scalar_lea.vmem %s2033_s9, %s1962_s17 }
  0x77   : > { %v417_v4 = vpack.c.bf16 %v411_v2, %v410_v1  ;;  %v413_v5 = vld [vmem:[%s395_s15 + $0x18] sm:$0xff]  ;;  %1413 = vmatpush3.bf16.msra.mxu1 %v1563_v8  ;;  %v1300_v22 = vld [vmem:[%s2031_s7] ss:$0 sm:$0xff]  ;;  %v1573_v37 = vld [vmem:[#allocation4 + $0x8] sm:$0xff]  }
  0x78   : > { %v418_v6 = vpack.c.bf16 %v413_v5, %v412_v3  ;;  %1414 = vmatprep.subr.bf16.mxu1 %v1564_v9  ;;  %v1577_v39 = vld [vmem:[#allocation4 + $0x18] sm:$0xff]   ;;  %v1579_v40 = vld [vmem:[#allocation4 + $0x20] sm:$0xff]   ;;  %v1581_v41 = vld [vmem:[#allocation4 + $0x28] sm:$0xff]  }
  0x79   : > { %1406 = vmatprep.mubr.msk.bf16.mxu0 %vm429_vm0, %v417_v4  ;;  %v1582_v42 = vld [vmem:[#allocation2 + $0x30] sm:$0xff]   ;;  %v1584_v44 = vld [vmem:[#allocation2 + $0x38] sm:$0xff]   ;;  %v1586_v46 = vld [vmem:[#allocation6] sm:$0xff]  }
  0x7a   : > { %1407 = vmatmul.mubr.msk.bf16.vlgmr.msra.gmra.mrb[0].mxu0 %vm429_vm0, %v418_v6  ;;  %v1583_v43 = vld [vmem:[#allocation4 + $0x30] sm:$0xff]   ;;  %v1585_v45 = vld [vmem:[#allocation4 + $0x38] sm:$0xff]   ;;  %v1304_v47 = vld [vmem:[%s2031_s7 + $0x1] ss:$0 sm:$0xff] }
  0x7b   : > { %1415 = vmatpush3.bf16.msra.mxu1 %v1564_v9  ;;  %1431 = vmatpush3.bf16.msra.mxu0 %v1570_v15  ;;  %v1587_v62 = vld [vmem:[#allocation6 + $0x8] sm:$0xff]   ;;  %v1588_v63 = vld [vmem:[#allocation6 + $0x10] sm:$0xff]   ;;  %v1589_v0 = vld [vmem:[#allocation6 + $0x18] sm:$0xff]  }
  0x7c   : > { %1416 = vmatprep.subr.bf16.mxu1 %v1565_v10  ;;  %1432 = vmatprep.subr.bf16.mxu0 %v1572_v17  ;;  %v1590_v1 = vld [vmem:[#allocation6 + $0x20] sm:$0xff]   ;;  %v1591_v2 = vld [vmem:[#allocation6 + $0x28] sm:$0xff]   ;;  %v1592_v3 = vld [vmem:[#allocation6 + $0x30] sm:$0xff]  }
  0x7d   : > { %v1593_v4 = vld [vmem:[#allocation6 + $0x38] sm:$0xff]   ;;  %v1594_v5 = vld [vmem:[#allocation7] sm:$0xff]   ;;  %v1595_v6 = vld [vmem:[#allocation7 + $0x8] sm:$0xff]  }
  0x7e   : > { %v1596_v7 = vld [vmem:[#allocation7 + $0x10] sm:$0xff]   ;;  %v1597_v8 = vld [vmem:[#allocation7 + $0x18] sm:$0xff]   ;;  %v1598_v9 = vld [vmem:[#allocation7 + $0x20] sm:$0xff]  }
  0x7f   : > { %1417 = vmatpush3.bf16.msra.mxu1 %v1565_v10  ;;  %1433 = vmatpush3.bf16.msra.mxu0 %v1572_v17  ;;  %v1599_v10 = vld [vmem:[#allocation7 + $0x28] sm:$0xff]  }
  0x80   : > { %1418 = vmatprep.subr.bf16.mxu1 %v1566_v11  ;;  %1434 = vmatprep.subr.bf16.mxu0 %v1574_v18 }
  0x83   : > { %1419 = vmatpush3.bf16.msra.mxu1 %v1566_v11  ;;  %1435 = vmatpush3.bf16.msra.mxu0 %v1574_v18  ;;  %v1322_v11 = vld [vmem:[%s2031_s7 + $0x3] ss:$0 sm:$0xff] }
  0x84   : > { %1420 = vmatprep.subr.bf16.mxu1 %v1567_v12  ;;  %1436 = vmatprep.subr.bf16.mxu0 %v1576_v19 }
  0x87   : > { %1421 = vmatpush3.bf16.msra.mxu1 %v1567_v12  ;;  %1437 = vmatpush3.bf16.msra.mxu0 %v1576_v19  ;;  %v1313_v12 = vld [vmem:[%s2031_s7 + $0x2] ss:$0 sm:$0xff] }
  0x88   : > { %1422 = vmatprep.subr.bf16.mxu1 %v1568_v13  ;;  %1438 = vmatprep.subr.bf16.mxu0 %v1578_v20 }
  0x8b   : > { %1423 = vmatpush3.bf16.msra.mxu1 %v1568_v13  ;;  %1439 = vmatpush3.bf16.msra.mxu0 %v1578_v20 }
  0x8c   : > { %1424 = vmatprep.subr.bf16.mxu1 %v1569_v14  ;;  %1440 = vmatprep.subr.bf16.mxu0 %v1580_v21 }
  0x8f   : > { %1425 = vmatpush3.bf16.msra.mxu1 %v1569_v14  ;;  %1441 = vmatpush3.bf16.msra.mxu0 %v1580_v21 }
  0x90   : > { %1450 = vmatprep.subr.bf16.mxu1 %v1571_v16  ;;  %1442 = vmatprep.subr.bf16.mxu0 %v1582_v42 }
  0x93   : > { %1443 = vmatpush3.bf16.msra.mxu0 %v1582_v42 }
  0x94   : > { %1444 = vmatprep.subr.bf16.mxu0 %v1584_v44 }
  0x97   : > { %1445 = vmatpush3.bf16.msra.mxu0 %v1584_v44 }
  0x98   : > { %1470 = vmatprep.subr.bf16.mxu0 %v1586_v46 }
 0x14d   : > { %v1408_v23 = vpop.f32.mrb[0].mxu0 }
 0x14e   : > { %v479_v24 = vadd.f32 %v1408_v23, %v1300_v22  ;;  %v470_v25 = vpop.f32.mrb[1].mxu0 }
 0x14f   : > { %v471_v26 = vadd.f32 %v1300_v22, %v470_v25  ;;  %v1409_v27 = vpop.f32.mrb[2].mxu0 }
 0x150   : > { %v482_v28 = vadd.f32 %v1409_v27, %v1300_v22  ;;  %v473_v29 = vpop.f32.mrb[3].mxu0  ;;  %v487_v31 = vmax.f32 %v479_v24, 0.0 }
 0x151   : > { %v474_v30 = vadd.f32 %v1300_v22, %v473_v29  ;;  %v485_v33 = vmax.f32 %v471_v26, 0.0 }
 0x152   : > { %v488_v32 = vmax.f32 %v482_v28, 0.0 }
 0x153   : > { %v486_v34 = vmax.f32 %v474_v30, 0.0 }
 0x154   : > { %v507_v35 = vpack.c.bf16 %v488_v32, %v487_v31 }
 0x155   : > { %v506_v36 = vpack.c.bf16 %v486_v34, %v485_v33 }
 0x157   : > { %1426 = vmatprep.mubr.bf16.mxu1 %v506_v36  ;;  %v1601_v36 = vld [vmem:[#allocation7 + $0x38] sm:$0xff]  }
 0x158   : > { %1427 = vmatmul.mubr.bf16.vlgmr.msra.gmra.mrb[0].mxu1 %v507_v35  ;;  %v1600_v35 = vld [vmem:[#allocation7 + $0x30] sm:$0xff]  }
 0x159   : > { %1451 = vmatpush3.bf16.msra.mxu1 %v1571_v16 }
 0x15a   : > { %1452 = vmatprep.subr.bf16.mxu1 %v1573_v37 }
 0x15d   : > { %1453 = vmatpush3.bf16.msra.mxu1 %v1573_v37  ;;  %v1331_v37 = vld [vmem:[%s2031_s7 + $0x4] ss:$0 sm:$0xff] }
 0x15e   : > { %1454 = vmatprep.subr.bf16.mxu1 %v1575_v38 }
 0x161   : > { %1455 = vmatpush3.bf16.msra.mxu1 %v1575_v38 }
 0x162   : > { %1456 = vmatprep.subr.bf16.mxu1 %v1577_v39 }
 0x165   : > { %1457 = vmatpush3.bf16.msra.mxu1 %v1577_v39 }
 0x166   : > { %1458 = vmatprep.subr.bf16.mxu1 %v1579_v40 }
 0x169   : > { %1459 = vmatpush3.bf16.msra.mxu1 %v1579_v40 }
 0x16a   : > { %1460 = vmatprep.subr.bf16.mxu1 %v1581_v41 }
 0x16d   : > { %1461 = vmatpush3.bf16.msra.mxu1 %v1581_v41 }
 0x16e   : > { %1462 = vmatprep.subr.bf16.mxu1 %v1583_v43 }
 0x171   : > { %1463 = vmatpush3.bf16.msra.mxu1 %v1583_v43 }
 0x172   : > { %1464 = vmatprep.subr.bf16.mxu1 %v1585_v45 }
 0x175   : > { %1465 = vmatpush3.bf16.msra.mxu1 %v1585_v45 }
 0x176   : > { %1490 = vmatprep.subr.bf16.mxu1 %v1594_v5 }
 0x22b   : > { %v1428_v48 = vpop.f32.mrb[0].mxu1 }
 0x22c   : > { %v603_v49 = vadd.f32 %v1428_v48, %v1304_v47  ;;  %v594_v50 = vpop.f32.mrb[1].mxu1 }
 0x22d   : > { %v595_v51 = vadd.f32 %v1304_v47, %v594_v50  ;;  %v1429_v52 = vpop.f32.mrb[2].mxu1 }
 0x22e   : > { %v606_v53 = vadd.f32 %v1429_v52, %v1304_v47  ;;  %v597_v54 = vpop.f32.mrb[3].mxu1  ;;  %v611_v56 = vmax.f32 %v603_v49, 0.0  ;;  %v1103_v52 = vlaneseq }
 0x22f   : > { %v598_v55 = vadd.f32 %v1304_v47, %v597_v54  ;;  %v609_v58 = vmax.f32 %v595_v51, 0.0  ;;  %v1340_v54 = vld [vmem:[%s2031_s7 + $0x5] ss:$0 sm:$0xff] }
 0x230   : > { %v612_v57 = vmax.f32 %v606_v53, 0.0  ;;  %v1104_v53 = vand.u32 127, %v1103_v52 }
 0x231   : > { %v610_v59 = vmax.f32 %v598_v55, 0.0 }
 0x232   : > { %v631_v60 = vpack.c.bf16 %v612_v57, %v611_v56  ;;  %vm1105_vm1 = vcmp.lt.s32.totalorder %v1104_v53, 8 }
 0x233   : > { %v630_v61 = vpack.c.bf16 %v610_v59, %v609_v58 }
 0x235   : > { %1446 = vmatprep.mubr.bf16.mxu0 %v630_v61  ;;  %1466 = vmatprep.mubr.bf16.mxu1 %v630_v61 }
 0x236   : > { %1447 = vmatmul.mubr.bf16.vlgmr.msra.gmra.mrb[4].mxu0 %v631_v60  ;;  %1467 = vmatmul.mubr.bf16.vlgmr.msra.gmra.mrb[4].mxu1 %v631_v60 }
 0x237   : > { %1471 = vmatpush3.bf16.msra.mxu0 %v1586_v46  ;;  %1491 = vmatpush3.bf16.msra.mxu1 %v1594_v5 }
 0x238   : > { %1472 = vmatprep.subr.bf16.mxu0 %v1587_v62  ;;  %1492 = vmatprep.subr.bf16.mxu1 %v1595_v6 }
 0x23b   : > { %1473 = vmatpush3.bf16.msra.mxu0 %v1587_v62  ;;  %1493 = vmatpush3.bf16.msra.mxu1 %v1595_v6 }
 0x23c   : > { %1474 = vmatprep.subr.bf16.mxu0 %v1588_v63  ;;  %1494 = vmatprep.subr.bf16.mxu1 %v1596_v7 }
 0x23f   : > { %1475 = vmatpush3.bf16.msra.mxu0 %v1588_v63  ;;  %1495 = vmatpush3.bf16.msra.mxu1 %v1596_v7 }
 0x240   : > { %1476 = vmatprep.subr.bf16.mxu0 %v1589_v0  ;;  %1496 = vmatprep.subr.bf16.mxu1 %v1597_v8 }
 0x243   : > { %1477 = vmatpush3.bf16.msra.mxu0 %v1589_v0  ;;  %1497 = vmatpush3.bf16.msra.mxu1 %v1597_v8 }
 0x244   : > { %1478 = vmatprep.subr.bf16.mxu0 %v1590_v1  ;;  %1498 = vmatprep.subr.bf16.mxu1 %v1598_v9 }
 0x247   : > { %1479 = vmatpush3.bf16.msra.mxu0 %v1590_v1  ;;  %1499 = vmatpush3.bf16.msra.mxu1 %v1598_v9 }
 0x248   : > { %1480 = vmatprep.subr.bf16.mxu0 %v1591_v2  ;;  %1500 = vmatprep.subr.bf16.mxu1 %v1599_v10 }
 0x24b   : > { %1481 = vmatpush3.bf16.msra.mxu0 %v1591_v2  ;;  %1501 = vmatpush3.bf16.msra.mxu1 %v1599_v10 }
 0x24c   : > { %1482 = vmatprep.subr.bf16.mxu0 %v1592_v3  ;;  %1502 = vmatprep.subr.bf16.mxu1 %v1600_v35 }
 0x24f   : > { %1483 = vmatpush3.bf16.msra.mxu0 %v1592_v3  ;;  %1503 = vmatpush3.bf16.msra.mxu1 %v1600_v35 }
 0x250   : > { %1484 = vmatprep.subr.bf16.mxu0 %v1593_v4  ;;  %1504 = vmatprep.subr.bf16.mxu1 %v1601_v36 }
 0x253   : > { %1485 = vmatpush3.bf16.msra.mxu0 %v1593_v4  ;;  %1505 = vmatpush3.bf16.msra.mxu1 %v1601_v36 }
 0x309   : > { %v1448_v13 = vpop.f32.mrb[4].mxu0  ;;  %v1468_v14 = vpop.f32.mrb[4].mxu1 }
 0x30a   : > { %v849_v15 = vadd.f32 %v1468_v14, %v1322_v11  ;;  %v718_v16 = vpop.f32.mrb[5].mxu0  ;;  %v840_v17 = vpop.f32.mrb[5].mxu1  ;;  %v727_v27 = vadd.f32 %v1448_v13, %v1313_v12 }
 0x30b   : > { %v719_v18 = vadd.f32 %v1313_v12, %v718_v16  ;;  %v841_v19 = vadd.f32 %v1322_v11, %v840_v17  ;;  %v1449_v20 = vpop.f32.mrb[6].mxu0  ;;  %v1469_v21 = vpop.f32.mrb[6].mxu1 }
 0x30c   : > { %v852_v22 = vadd.f32 %v1469_v21, %v1322_v11  ;;  %v721_v23 = vpop.f32.mrb[7].mxu0  ;;  %v843_v24 = vpop.f32.mrb[7].mxu1  ;;  %v857_v28 = vmax.f32 %v849_v15, 0.0  ;;  %v730_v31 = vadd.f32 %v1449_v20, %v1313_v12  ;;  %735 = vst [vmem:[%s401_s26 + $0x10] sm:$0xff] %v727_v27 }
 0x30d   : > { %733 = vst [vmem:[%s401_s26] sm:$0xff] %v719_v18  ;;  %v722_v25 = vadd.f32 %v1313_v12, %v721_v23  ;;  %v844_v26 = vadd.f32 %v1322_v11, %v843_v24  ;;  %v855_v30 = vmax.f32 %v841_v19, 0.0 }
 0x30e   : > { %v858_v29 = vmax.f32 %v852_v22, 0.0  ;;  %736 = vst [vmem:[%s401_s26 + $0x18] sm:$0xff] %v730_v31 }
 0x30f   : > { %734 = vst [vmem:[%s401_s26 + $0x8] sm:$0xff] %v722_v25  ;;  %v856_v32 = vmax.f32 %v844_v26, 0.0 }
 0x310   : > { %v877_v33 = vpack.c.bf16 %v858_v29, %v857_v28 }
 0x311   : > { %v876_v34 = vpack.c.bf16 %v856_v32, %v855_v30 }
 0x313   : > { %1486 = vmatprep.mubr.bf16.mxu0 %v876_v34 }
 0x314   : > { %1487 = vmatmul.mubr.bf16.vlgmr.msra.gmra.mrb[8].mxu0 %v877_v33 }
 0x3e7   : > { %v1488_v38 = vpop.f32.mrb[8].mxu0 }
 0x3e8   : > { %v973_v39 = vadd.f32 %v1488_v38, %v1331_v37  ;;  %v964_v40 = vpop.f32.mrb[9].mxu0 }
 0x3e9   : > { %v965_v41 = vadd.f32 %v1331_v37, %v964_v40  ;;  %v1489_v42 = vpop.f32.mrb[10].mxu0 }
 0x3ea   : > { %v976_v43 = vadd.f32 %v1489_v42, %v1331_v37  ;;  %v967_v44 = vpop.f32.mrb[11].mxu0  ;;  %v981_v46 = vmax.f32 %v973_v39, 0.0 }
 0x3eb   : > { %v968_v45 = vadd.f32 %v1331_v37, %v967_v44  ;;  %v979_v48 = vmax.f32 %v965_v41, 0.0 }
 0x3ec   : > { %v982_v47 = vmax.f32 %v976_v43, 0.0 }
 0x3ed   : > { %v980_v49 = vmax.f32 %v968_v45, 0.0 }
 0x3ee   : > { %v1001_v50 = vpack.c.bf16 %v982_v47, %v981_v46 }
 0x3ef   : > { %v1000_v51 = vpack.c.bf16 %v980_v49, %v979_v48 }
 0x3f1   : > { %1506 = vmatprep.mubr.bf16.mxu1 %v1000_v51 }
 0x3f2   : > { %1507 = vmatmul.mubr.bf16.vlgmr.msra.gmra.mrb[8].mxu1 %v1001_v50 }
 0x4c5   : > { %v1508_v55 = vpop.f32.mrb[8].mxu1 }
 0x4c6   : > { %v1097_v56 = vadd.f32 %v1508_v55, %v1340_v54  ;;  %v1088_v57 = vpop.f32.mrb[9].mxu1 }
 0x4c7   : > { %v1089_v58 = vadd.f32 %v1340_v54, %v1088_v57  ;;  %v1509_v59 = vpop.f32.mrb[10].mxu1 }
 0x4c8   : > { %v1100_v60 = vadd.f32 %v1509_v59, %v1340_v54  ;;  %v1091_v61 = vpop.f32.mrb[11].mxu1  ;;  %v1108_v62 = vsel %vm1105_vm1, %v1097_v56, -1e+30 }
 0x4c9   : > { %v1092_v63 = vadd.f32 %v1340_v54, %v1091_v61  ;;  %1114 = vmax.xlane.f32.xlu1 %v1108_v62  ;;  %v1106_v0 = vsel %vm1105_vm1, %v1089_v58, -1e+30 }
 0x4ca   : > { %1110 = vmax.xlane.f32.xlu0 %v1106_v0  ;;  %v1109_v1 = vsel %vm1105_vm1, %v1100_v60, -1e+30 }
 0x4cb   : > { %v1107_v2 = vsel %vm1105_vm1, %v1092_v63, -1e+30 }
 0x4cd   : > { %1116 = vmax.xlane.f32.xlu1 %v1109_v1 }
 0x4ce   : > { %1112 = vmax.xlane.f32.xlu0 %v1107_v2 }
 0x556   : > { %v1115_v3 = vpop.xlane.xlu1 %1114 }
 0x557   : > { %v1120_v4 = vsub.f32 %v1108_v62, %v1115_v3  ;;  %v1111_v5 = vpop.xlane.xlu0 %1110 }
 0x558   : > { %v1118_v6 = vsub.f32 %v1106_v0, %v1111_v5 }
 0x559   : > { %v1126_v9 = vmul.f32 1.442695, %v1120_v4 }
 0x55a   : > { %v1122_v7 = vmul.f32 1.442695, %v1118_v6  ;;  %v1117_v8 = vpop.xlane.xlu1 %1116 }
 0x55b   : > { %v1113_v10 = vpop.xlane.xlu0 %1112  ;;  %v1121_v11 = vsub.f32 %v1109_v1, %v1117_v8 }
 0x55c   : > { %1602 = vpow2.f32 %v1122_v7  ;;  %v1119_v12 = vsub.f32 %v1107_v2, %v1113_v10 }
 0x55d   : > { %1604 = vpow2.f32 %v1126_v9  ;;  %v1128_v14 = vmul.f32 1.442695, %v1121_v11 }
 0x55e   : > { %v1124_v13 = vmul.f32 1.442695, %v1119_v12 }
 0x560   : > { %1606 = vpow2.f32 %v1124_v13 }
 0x561   : > { %1608 = vpow2.f32 %v1128_v14 }
 0x566   : > { %v1603_v15 = vpop.eup %1602 }
 0x567   : > { %1130 = vadd.xlane.f32.xlu0 %v1603_v15  ;;  %v1605_v16 = vpop.eup %1604 }
 0x56a   : > { %v1607_v17 = vpop.eup %1606 }
 0x56b   : > { %1134 = vadd.xlane.f32.xlu0 %v1605_v16  ;;  %1132 = vadd.xlane.f32.xlu1 %v1607_v17  ;;  %v1609_v18 = vpop.eup %1608 }
 0x56f   : > { %1136 = vadd.xlane.f32.xlu1 %v1609_v18 }
 0x5f4   : > { %v1131_v19 = vpop.xlane.xlu0 %1130 }
 0x5f5   : > { %1610 = vrcp.f32 %v1131_v19 }
 0x5f8   : > { %v1133_v20 = vpop.xlane.xlu1 %1132  ;;  %v1135_v21 = vpop.xlane.xlu0 %1134 }
 0x5f9   : > { %1612 = vrcp.f32 %v1133_v20 }
 0x5fa   : > { %1614 = vrcp.f32 %v1135_v21 }
 0x5fc   : > { %v1137_v22 = vpop.xlane.xlu1 %1136 }
 0x5fd   : > { %1616 = vrcp.f32 %v1137_v22 }
 0x5ff   : > { %v1611_v23 = vpop.eup %1610 }
 0x600   : > { %v1139_v24 = vmul.f32 %v1611_v23, %v1603_v15 }
 0x602   : > { %1146 = vst [vmem:[%s407_s21] sm:$0xff] %v1139_v24 }
 0x603   : > { %v1613_v25 = vpop.eup %1612 }
 0x604   : > { %v1615_v26 = vpop.eup %1614  ;;  %v1141_v27 = vmul.f32 %v1613_v25, %v1607_v17 }
 0x605   : > { %v1143_v28 = vmul.f32 %v1615_v26, %v1605_v16 }
 0x606   : > { %1147 = vst [vmem:[%s407_s21 + $0x8] sm:$0xff] %v1141_v27 }
 0x607   : > { %v1617_v29 = vpop.eup %1616  ;;  %1148 = vst [vmem:[%s407_s21 + $0x10] sm:$0xff] %v1143_v28 }
 0x608   : > { %v1145_v30 = vmul.f32 %v1617_v29, %v1609_v18 }
 0x60a   : > { %1149 = vst [vmem:[%s407_s21 + $0x18] sm:$0xff] %v1145_v30 }
 0x60b PF: > { %s23_s30 = sadd.s32 1, %s1748_s30  }
 0x60c   : > { %p20_p3 = scmp.ge.s32.totalorder %s23_s30, 4  }
 0x60e   :  { %22 = sbr.rel (!%p20_p3) target bundleno = 3 (0x3), region = 111 }
 0x615   :  { %1189 = vsyncpa [#allocation3], 1 }
 0x616   :  { %1191 = vsyncpa [#allocation3 + $0x1], 1 }
 0x617   :  { %1192 = vsyncpa [#allocation5], 1 }
 0x618   :  { %1193 = vsyncpa [#allocation8], 1 }

</bundles_post_ra>
